<compile_context>
chip_gen: v5e
topology: v5e:2x2
jax: 0.10.0
libtpu: 0.0.40
codegen_flags: <defaults>
</compile_context>

<pallas_src>
import functools

import jax
import jax.numpy as jnp
from jax.experimental import pallas as pl
from jax.experimental.pallas import tpu as pltpu


# ---------------------------------------------------------------------------
# Kernels
# ---------------------------------------------------------------------------

def _attn_single_k_kernel(x1_ref, x2_ref, o_ref, *, scale, exp_dtype):
    """All of Lk fits one tile: plain softmax, no online-softmax state."""
    q = x1_ref[...]
    if scale is not None:
        # Fold the scale into Q: Lq*D multiplies instead of Lq*Lk.
        q = q * jnp.asarray(scale, dtype=q.dtype)
    kv = x2_ref[...]

    # QK^T without materializing a transpose: contract the last dims directly.
    s = jnp.einsum("bqd,bkd->bqk", q, kv,
                   preferred_element_type=jnp.float32)            # (BT, TQ, Lk)
    m = jnp.max(s, axis=-1, keepdims=True)
    p = jnp.exp((s - m).astype(exp_dtype))
    l = jnp.sum(p.astype(jnp.float32), axis=-1, keepdims=True)
    acc = jnp.einsum("bqk,bkd->bqd", p.astype(kv.dtype), kv,
                     preferred_element_type=jnp.float32)
    # Exact reciprocal: only BT*TQ of them, approx error is not worth it.
    o_ref[...] = (acc * pl.reciprocal(l, approx=False)).astype(o_ref.dtype)


def _attn_flash_kernel(x1_ref, x2_ref, o_ref, m_sc, l_sc, *maybe_acc,
                       scale, exp_dtype):
    """K/V streamed over the last grid axis with online (flash) softmax."""
    # If no accumulator scratch was passed, accumulate directly into the
    # VMEM-resident f32 output block (its index_map ignores ki).
    acc_ref = maybe_acc[0] if maybe_acc else o_ref
    ki = pl.program_id(2)

    @pl.when(ki == 0)
    def _init():
        m_sc[...] = jnp.full(m_sc.shape, -jnp.inf, dtype=m_sc.dtype)
        l_sc[...] = jnp.zeros(l_sc.shape, dtype=l_sc.dtype)
        acc_ref[...] = jnp.zeros(acc_ref.shape, dtype=acc_ref.dtype)

    q = x1_ref[...]
    if scale is not None:
        q = q * jnp.asarray(scale, dtype=q.dtype)
    kv = x2_ref[...]

    s = jnp.einsum("bqd,bkd->bqk", q, kv,
                   preferred_element_type=jnp.float32)            # (BT, TQ, TK)

    m_prev = m_sc[...]
    m_new = jnp.maximum(m_prev, jnp.max(s, axis=-1, keepdims=True))
    alpha = jnp.exp(m_prev - m_new)                                # f32 stats
    p = jnp.exp((s - m_new).astype(exp_dtype))

    l_sc[...] = alpha * l_sc[...] + jnp.sum(p.astype(jnp.float32),
                                            axis=-1, keepdims=True)
    pv = jnp.einsum("bqk,bkd->bqd", p.astype(kv.dtype), kv,
                    preferred_element_type=jnp.float32)
    acc_ref[...] = alpha * acc_ref[...] + pv
    m_sc[...] = m_new

    @pl.when(ki == pl.num_programs(2) - 1)
    def _finalize():
        inv_l = pl.reciprocal(l_sc[...], approx=False)             # exact
        o_ref[...] = (acc_ref[...] * inv_l).astype(o_ref.dtype)


# ---------------------------------------------------------------------------
# Wrapper
# ---------------------------------------------------------------------------

def _round_up(x, m):
    return ((x + m - 1) // m) * m


def _largest_tile(n, candidates):
    for c in candidates:
        if c <= n and n % c == 0:
            return c
    return n  # block == full array dim is always a legal block shape


def _vmem_capacity_bytes():
    try:
        return int(pltpu.get_tpu_info().vmem_capacity_bytes)
    except Exception:
        return None


def attention_bmm(x1, x2, scale_factor=None, compute_dtype=None,
                  max_kv_tile=1024):
    """softmax(x1 @ x2^T [* scale]) @ x2 per batch element (eval mode).

    x1: (B, Lq, D), x2: (B, Lk, D) -> (B, Lq, D).
    scale_factor=None reproduces the module's default (no scaling).
    compute_dtype=jnp.bfloat16 is the recommended perf config on v5e/v6e/v7x
    (bf16 MXU operands + bf16 exp, f32 stats/accumulation); the default keeps
    the input dtype so f32 inputs match the PyTorch module bit-for-bit-ish.
    """
    B, Lq, D = x1.shape
    B2, Lk, D2 = x2.shape
    assert B == B2 and D == D2, "shape mismatch between x1 and x2"

    if compute_dtype is not None:
        x1 = x1.astype(compute_dtype)
        x2 = x2.astype(compute_dtype)
    in_dtype = jnp.dtype(x1.dtype)
    out_dtype = in_dtype
    out_is_f32 = out_dtype == jnp.dtype(jnp.float32)
    exp_dtype = jnp.bfloat16 if in_dtype == jnp.dtype(jnp.bfloat16) else jnp.float32
    itemsize = in_dtype.itemsize

    # ---- tile selection: TQ first (MXU row fill), then TK ----
    TQ = _largest_tile(Lq, (512, 256, 128, 64, 32, 16, 8))
    tk_cands = tuple(c for c in (1024, 512, 256, 128, 64, 32, 16, 8)
                     if c <= max_kv_tile)
    TK = _largest_tile(Lk, tk_cands) if tk_cands else Lk

    # ---- generation-aware VMEM budgets ----
    vmem_cap = _vmem_capacity_bytes()
    if vmem_cap is not None and vmem_cap >= 100 * 2**20:   # v5e/v6e: 128 MiB
        block_budget, vmem_cap_limit = 12 * 2**20, 64 * 2**20
    else:                                                   # v7x (64 MiB) / unknown
        block_budget, vmem_cap_limit = 6 * 2**20, 36 * 2**20

    def per_batch_bytes(tq, tk):
        dpad = _round_up(D, 128)
        tqp, tkp = _round_up(tq, 8), _round_up(tk, 8)
        single = (tk == Lk)
        bytes_ = 2 * (tqp * dpad + tkp * dpad) * itemsize   # double-buffered inputs
        bytes_ += 2 * tqp * dpad * out_dtype.itemsize       # double-buffered output
        if not single:
            bytes_ += 2 * tqp * 128 * 4                     # m / l (lane-padded)
            if not out_is_f32:
                bytes_ += tqp * dpad * 4                    # f32 accumulator scratch
        bytes_ += 3 * tqp * _round_up(tk, 128) * 4          # s / p / exp temporaries
        return bytes_

    def _halve(tile, total):
        h = tile // 2
        return h if h >= 8 and total % h == 0 else tile

    # Shrink tiles (TK first) until one batch element fits the block budget.
    while per_batch_bytes(TQ, TK) > block_budget:
        if TK >= TQ and _halve(TK, Lk) != TK:
            TK = _halve(TK, Lk)
        elif _halve(TQ, Lq) != TQ:
            TQ = _halve(TQ, Lq)
        elif _halve(TK, Lk) != TK:
            TK = _halve(TK, Lk)
        else:
            break

    single_k = (TK == Lk)
    per_batch = per_batch_bytes(TQ, TK)

    # Batch-block to amortize grid-step overhead; keep >= 2 parallel grid steps
    # when there is only one q tile so both TensorCores (v7x) get work.
    if (Lq // TQ) >= 2 or B < 2:
        max_bt = B
    else:
        max_bt = max(1, B // 2)
    BT = 1
    for d in range(max_bt, 0, -1):
        if B % d == 0 and d * per_batch <= block_budget:
            BT = d
            break

    vmem_limit = int(min(vmem_cap_limit, max(2 * BT * per_batch, 24 * 2**20)))

    if single_k:
        kernel = functools.partial(_attn_single_k_kernel,
                                   scale=scale_factor, exp_dtype=exp_dtype)
        grid = (B // BT, Lq // TQ)
        grid_spec = pltpu.PrefetchScalarGridSpec(
            num_scalar_prefetch=0,
            grid=grid,
            in_specs=[
                pl.BlockSpec((BT, TQ, D), lambda b, qi: (b, qi, 0)),
                # index_map ignores qi -> K/V stays VMEM-resident across q tiles.
                pl.BlockSpec((BT, Lk, D), lambda b, qi: (b, 0, 0)),
            ],
            out_specs=pl.BlockSpec((BT, TQ, D), lambda b, qi: (b, qi, 0)),
        )
        dim_sem = ("parallel", "parallel")
    else:
        kernel = functools.partial(_attn_flash_kernel,
                                   scale=scale_factor, exp_dtype=exp_dtype)
        grid = (B // BT, Lq // TQ, Lk // TK)
        scratch = [
            pltpu.VMEM((BT, TQ, 1), jnp.float32),   # running max m
            pltpu.VMEM((BT, TQ, 1), jnp.float32),   # running sum l
        ]
        if not out_is_f32:
            scratch.append(pltpu.VMEM((BT, TQ, D), jnp.float32))  # f32 accumulator
        grid_spec = pltpu.PrefetchScalarGridSpec(
            num_scalar_prefetch=0,
            grid=grid,
            in_specs=[
                pl.BlockSpec((BT, TQ, D), lambda b, qi, ki: (b, qi, 0)),
                pl.BlockSpec((BT, TK, D), lambda b, qi, ki: (b, ki, 0)),
            ],
            out_specs=pl.BlockSpec((BT, TQ, D), lambda b, qi, ki: (b, qi, 0)),
            scratch_shapes=scratch,
        )
        dim_sem = ("parallel", "parallel", "arbitrary")

    return pl.pallas_call(
        kernel,
        out_shape=jax.ShapeDtypeStruct((B, Lq, D), out_dtype),
        grid_spec=grid_spec,
        compiler_params=pltpu.CompilerParams(
            dimension_semantics=dim_sem,
            vmem_limit_bytes=vmem_limit,
        ),
    )(x1, x2)


# ---------------------------------------------------------------------------
# References & self-test
# ---------------------------------------------------------------------------

def _reference(x1, x2, scale_factor=None):
    qk = jnp.einsum("bqd,bkd->bqk", x1, x2, precision="highest")
    if scale_factor is not None:
        qk = qk * scale_factor
    p = jax.nn.softmax(qk, axis=-1)
    return jnp.einsum("bqk,bkd->bqd", p, x2, precision="highest")


def _reference_bf16(x1, x2, scale_factor=None):
    """Precision-matched reference for the bf16 compute path."""
    q = x1.astype(jnp.bfloat16)
    kv = x2.astype(jnp.bfloat16)
    if scale_factor is not None:
        q = q * jnp.asarray(scale_factor, jnp.bfloat16)
    s = jnp.einsum("bqd,bkd->bqk", q, kv,
                   preferred_element_type=jnp.float32, precision="highest")
    m = jnp.max(s, axis=-1, keepdims=True)
    p = jnp.exp((s - m).astype(jnp.bfloat16))
    l = jnp.sum(p.astype(jnp.float32), axis=-1, keepdims=True)
    acc = jnp.einsum("bqk,bkd->bqd", p, kv,
                     preferred_element_type=jnp.float32, precision="highest")
    return (acc / l).astype(jnp.bfloat16)


if __name__ == "__main__":
    key = jax.random.PRNGKey(0)
    k1, k2 = jax.random.split(key)

    # Small shapes consistent with the module's bmm semantics.
    B, Lq, Lk, D = 2, 8, 16, 32
    x1 = jax.random.normal(k1, (B, Lq, D), dtype=jnp.float32)
    x2 = jax.random.normal(k2, (B, Lk, D), dtype=jnp.float32)

    # Tolerance note: the kernel uses exact reciprocal and f32 accumulation,
    # but f32 matmuls executed through XLA:TPU's default (bf16-pass) precision
    # -- e.g. when the kernel runs in interpret mode, or in the plain-JAX
    # reference without precision="highest" -- carry ~1e-2 error at these
    # score magnitudes. 3e-2 covers that while catching real algorithm bugs.
    tol = dict(atol=3e-2, rtol=3e-2)

    # 1) Default path (f32, no scaling — matches the module's maxsize default).
    out = jax.block_until_ready(attention_bmm(x1, x2))
    ref = _reference(x1, x2)
    assert out.shape == (B, Lq, D)
    assert jnp.allclose(out, ref, **tol), float(jnp.max(jnp.abs(out - ref)))

    # 2) scale_factor path.
    out_s = jax.block_until_ready(attention_bmm(x1, x2, scale_factor=0.125))
    ref_s = _reference(x1, x2, scale_factor=0.125)
    assert jnp.allclose(out_s, ref_s, **tol), float(jnp.max(jnp.abs(out_s - ref_s)))

    # 3) Multi-K-tile flash path (online softmax, resident f32 output accumulator).
    out_f = jax.block_until_ready(attention_bmm(x1, x2, max_kv_tile=8))
    assert jnp.allclose(out_f, ref, **tol), float(jnp.max(jnp.abs(out_f - ref)))

    # 4) bf16 compute path (recommended perf config on v5e/v6e/v7x), checked
    #    against a precision-matched reference.
    out_b = jax.block_until_ready(attention_bmm(x1, x2, compute_dtype=jnp.bfloat16))
    ref_b = _reference_bf16(x1, x2)
    diff = jnp.abs(out_b.astype(jnp.float32) - ref_b.astype(jnp.float32))
    assert jnp.allclose(out_b.astype(jnp.float32), ref_b.astype(jnp.float32),
                        atol=5e-2, rtol=5e-2), float(jnp.max(diff))

    print("KERNEL_OK")
</pallas_src>

<mosaic_0001>
module attributes {stable_mosaic.version = 11 : i64} {
  func.func @_attn_single_k_kernel(%arg0: i32, %arg1: i32, %arg2: memref<1x8x32xf32, #tpu.memory_space<vmem>>, %arg3: memref<1x16x32xf32, #tpu.memory_space<vmem>>, %arg4: memref<1x8x32xf32, #tpu.memory_space<vmem>>) attributes {dimension_semantics = [#tpu.dimension_semantics<parallel>, #tpu.dimension_semantics<parallel>], iteration_bounds = array<i64: 2, 1>, scalar_prefetch = 0 : i64, scratch_operands = 0 : i64, tpu.core_type = #tpu.core_type<tc>, window_params = [{transform_indices = @transform_0, window_bounds = array<i64: 1, 8, 32>}, {transform_indices = @transform_1, window_bounds = array<i64: 1, 16, 32>}, {transform_indices = @transform_2, window_bounds = array<i64: 1, 8, 32>}]} {
    %c0 = arith.constant 0 : index
    %c0_0 = arith.constant 0 : index
    %c0_1 = arith.constant 0 : index
    %0 = vector.load %arg2[%c0, %c0_0, %c0_1] : memref<1x8x32xf32, #tpu.memory_space<vmem>>, vector<1x8x32xf32>
    %c0_2 = arith.constant 0 : index
    %c0_3 = arith.constant 0 : index
    %c0_4 = arith.constant 0 : index
    %1 = vector.load %arg3[%c0_2, %c0_3, %c0_4] : memref<1x16x32xf32, #tpu.memory_space<vmem>>, vector<1x16x32xf32>
    "tpu.trace_start"() <{level = 10 : i32, message = "bqd,bkd->bqk"}> : () -> ()
    %cst = arith.constant dense<0.000000e+00> : vector<1x8x16xf32>
    %2 = tpu.matmul %0, %1, %cst {dimension_numbers = #tpu.dot_dimension_numbers<[2], [2], [1], [1], [0, 0, 0, 1, 1, 1], [0], [0]>} : vector<1x8x32xf32>, vector<1x16x32xf32>, vector<1x8x16xf32> -> vector<1x8x16xf32>
    "tpu.trace_stop"() : () -> ()
    %cst_5 = arith.constant dense<0xFF800000> : vector<1x8xf32>
    %3 = vector.multi_reduction <maximumf>, %2, %cst_5 [2] : vector<1x8x16xf32> to vector<1x8xf32>
    %4 = vector.shape_cast %3 : vector<1x8xf32> to vector<1x8x1xf32>
    %5 = vector.broadcast %4 : vector<1x8x1xf32> to vector<1x8x16xf32>
    %6 = arith.subf %2, %5 : vector<1x8x16xf32>
    %7 = math.exp %6 : vector<1x8x16xf32>
    %cst_6 = arith.constant dense<0.000000e+00> : vector<1x8xf32>
    %8 = vector.multi_reduction <add>, %7, %cst_6 [2] : vector<1x8x16xf32> to vector<1x8xf32>
    %9 = vector.shape_cast %8 : vector<1x8xf32> to vector<1x8x1xf32>
    "tpu.trace_start"() <{level = 10 : i32, message = "bqk,bkd->bqd"}> : () -> ()
    %cst_7 = arith.constant dense<0.000000e+00> : vector<1x8x32xf32>
    %10 = tpu.matmul %7, %1, %cst_7 {dimension_numbers = #tpu.dot_dimension_numbers<[2], [1], [1], [2], [0, 0, 0, 1, 1, 2], [0], [0]>} : vector<1x8x16xf32>, vector<1x16x32xf32>, vector<1x8x32xf32> -> vector<1x8x32xf32>
    "tpu.trace_stop"() : () -> ()
    %11 = tpu.reciprocal %9 : vector<1x8x1xf32> -> vector<1x8x1xf32>
    %12 = vector.broadcast %11 : vector<1x8x1xf32> to vector<1x8x32xf32>
    %13 = arith.mulf %10, %12 : vector<1x8x32xf32>
    %c0_8 = arith.constant 0 : index
    %c0_9 = arith.constant 0 : index
    %c0_10 = arith.constant 0 : index
    %14 = vector.load %arg4[%c0_8, %c0_9, %c0_10] : memref<1x8x32xf32, #tpu.memory_space<vmem>>, vector<1x8x32xf32>
    tpu.vector_store %arg4[%c0_8, %c0_9, %c0_10], %13 {strides = array<i32>} : memref<1x8x32xf32, #tpu.memory_space<vmem>>, vector<1x8x32xf32>,
    return
  }
  func.func @transform_0(%arg0: i32, %arg1: i32) -> (i32, i32, i32) {
    %c0_i32 = arith.constant 0 : i32
    %c0_i32_0 = arith.constant 0 : i32
    return %arg0, %arg1, %c0_i32 : i32, i32, i32
  }
  func.func @transform_1(%arg0: i32, %arg1: i32) -> (i32, i32, i32) {
    %c0_i32 = arith.constant 0 : i32
    %c0_i32_0 = arith.constant 0 : i32
    %c0_i32_1 = arith.constant 0 : i32
    return %arg0, %c0_i32, %c0_i32_0 : i32, i32, i32
  }
  func.func @transform_2(%arg0: i32, %arg1: i32) -> (i32, i32, i32) {
    %c0_i32 = arith.constant 0 : i32
    %c0_i32_0 = arith.constant 0 : i32
    return %arg0, %arg1, %c0_i32 : i32, i32, i32
  }
}

</mosaic_0001>

<bundles_post_ra>
// kernel: tpu_custom_call.1
= control target key start
LH: loop header
LB: loop body
LE: loop exit
PB: predicated region body
PF: predicated region fallthrough
CT: control target
= control target key end

     0   :  { %7 = vsyncpa [#allocation3], 0  ;;  %s834_s0 = inlined_call_operand.hbm [shape: f32[2,8,32], index: 0, kind: input, shape index: {}]   ;;  %s835_s1 = inlined_call_operand.hbm [shape: f32[2,16,32], index: 1, kind: input, shape index: {}]   ;;  %s836_s2 = inlined_call_operand.hbm [shape: f32[2,8,32], index: 2, kind: output, shape index: {}]  }
   0x1   :  { %9 = vsyncpa [#allocation3 + $0x1], 0 }
   0x2   :  { %10 = vsyncpa [#allocation6], 0 }
   0x3   :  { %12 = vsyncpa [#allocation6 + $0x1], 0 }
   0x4   :  { %13 = vsyncpa [#allocation4], 0 }
   0x5   :  { %15 = vsyncpa [#allocation4 + $0x1], 0  ;;  %s682_s9 = smov 0   ;;  %s684_s10 = smov 0  }
   0x6   :  { %s686_s11 = smov 0   ;;  %s688_s12 = smov 0  }
   0x7   :  { %s690_s13 = smov 0   ;;  %s692_s14 = smov 0  }
   0x8 LB: > { %s422_s15 = sadd.s32 4294967295, %s663_s14   ;;  %s423_s16 = sadd.s32 4294967294, %s663_s14   ;;  %s663_s14 = sphi %s692_s14, %s21_s14   ;;  %s659_s13 = sphi %s690_s13, %s846_s13   ;;  %s655_s12 = sphi %s688_s12, %s845_s12   ;;  %s651_s11 = sphi %s686_s11, %s844_s11   ;;  %s647_s10 = sphi %s684_s10, %s843_s10   ;;  %s643_s9 = sphi %s682_s9, %s842_s9  }
   0x9   : > { %s33_s17 = sadd.s32 1, %s659_s13  ;;  %s42_s18 = sadd.s32 1, %s651_s11 }
   0xa   : > { %p35_p0 = scmp.ge.s32.totalorder %s33_s17, 2  ;;  %p49_p1 = scmp.ne.s32.totalorder %s651_s11, %s647_s10 }
   0xb   : > { %p50_p2 = scmp.eq.s32.totalorder %s663_s14, 0  ;;  %p55_p3 = scmp.ne.s32.totalorder %s647_s10, %s643_s9 }
   0xc   : > { %s848_s17 = smov (%p35_p0, %s33_s17), 0  ;;  %p56_p5 = scmp.eq.s32.totalorder %s422_s15, 0 }
   0xd   : > { %p723_p4 = por %p50_p2, %p49_p1  ;;  %s37_s20 = ssub.s32 %s659_s13, %s848_s17 }
   0xe   : > { %p107_p6 = scmp.eq.s32.totalorder %s422_s15, 1  ;;  %p40_p7 = scmp.eq.s32.totalorder %s37_s20, 0 }
   0xf   : > { %p729_p8 = por %p56_p5, %p55_p3  ;;  %p113_p10 = scmp.eq.s32.totalorder %s423_s16, 1 }
  0x10   : > { %p733_p9 = por %p107_p6, %p49_p1  ;;  %p425_p12 = scmp.ge.s32.totalorder %s663_s14, 2 }
  0x11   : > { %s738_s23 = scalar_select %p40_p7, %s651_s11, %s42_s18  }
  0x12   : > { %p740_p11 = por %p113_p10, %p55_p3  ;;  %p461_p13 = scmp.lt.s32.totalorder %s663_s14, 2 }
  0x13   : > { %s747_s25 = sand.u32 1, %s651_s11   ;;  %s427_s27 = sshll.u32 %s659_s13, 3 }
  0x14   : > { %s426_s26 = sshll.u32 %s747_s25, 3  ;;  %s142_s30 = scalar_lea.hbm %s834_s0, %s427_s27 }
  0x15   : > { %s137_s3 = scalar_lea.vmem [#allocation2], %s426_s26  ;;  %s144_s5 = sshll.u32 %s142_s30, 4  ;;  %s145_s5 = int_to_ptr.hbm [resolvable:$true] %s144_s5 }
  0x16   : > { %s146_s4 = sshll.u32 %s137_s3, 4  ;;  %p756_p0 = pnand %p461_p13, %p723_p4  ;;  %s147_s4 = int_to_ptr.vmem [resolvable:$true] %s146_s4 }
  0x17   : > { %p431_p1 = scmp.ge.s32.totalorder %s663_s14, 1  ;;  %p173_p2 = scmp.lt.s32.totalorder %s663_s14, 3 }
  0x18   : > { %s134_s7 = scalar_lea.sflag [#allocation3], %s747_s25  ;;  %s428_s8 = sshll.u32 %s747_s25, 4 }
  0x19   : > { %453 = dma.hbm_to_vmem [thread:$0]  (!%p756_p0), %s145_s5, 128, %s147_s4, %s134_s7  }
  0x1a   : > { %p174_p3 = pnand %p431_p1, %p173_p2  ;;  %s443_s15 = sshll.u32 %s659_s13, 4 }
  0x1b   : > { %s162_s20 = scalar_lea.hbm %s835_s1, %s443_s15  ;;  %s157_s26 = scalar_lea.vmem [#allocation5], %s428_s8 }
  0x1c   : > { %s165_s19 = sshll.u32 %s157_s26, 4  ;;  %s163_s27 = sshll.u32 %s162_s20, 4  ;;  %s166_s19 = int_to_ptr.vmem [resolvable:$true] %s165_s19  ;;  %s164_s27 = int_to_ptr.hbm [resolvable:$true] %s163_s27 }
  0x1d   : > { %s154_s28 = scalar_lea.sflag [#allocation6], %s747_s25  ;;  %s665_s29 = smov 128  }
  0x1e   : > { %s666_s30 = smov 8   ;;  %177 = sbr.rel (%p174_p3) target bundleno = 440 (0x1b8), region = 28 }
  0x1f   : > { %456 = dma.hbm_to_vmem [thread:$0]  (!%p756_p0), %s164_s27, 256, %s166_s19, %s154_s28, %s665_s29, %s665_s29, %s666_s30  }
  0x20   : > { %s774_s3 = sand.u32 (!%p174_p3), 1, %s647_s10  }
  0x21   : > { %s432_s4 = sshll.u32 (!%p174_p3), %s774_s3, 3  ;;  %s180_s5 = scalar_lea.sflag (!%p174_p3), [#allocation3], %s774_s3 }
  0x22   : > { %s183_s7 = scalar_lea.vmem (!%p174_p3), [#allocation2], %s432_s4 }
  0x23   : > { %630 = dma.done.wait (%p729_p8), %s180_s5, 128  }
  0x24   : > { %632 = vsyncadd (%p729_p8), %s180_s5, 4294967168  ;;  %s433_s25 = sshll.u32 %s774_s3, 4  ;;  %s190_s6 = scalar_lea.sflag [#allocation6], %s774_s3 }
  0x25   : > { %s193_s8 = scalar_lea.vmem [#allocation5], %s433_s25 }
  0x26   : > { %634 = dma.done.wait (%p729_p8), %s190_s6, 256  }
  0x27   : > { %636 = vsyncadd (%p729_p8), %s190_s6, 4294967040  ;;  %vm223_vm0 = vcmask 261120   ;;  %v222_v0 = vld [vmem:[%s193_s8 + $0x8] sm:$0xff]  ;;  %v221_v1 = vld [vmem:[%s193_s8] sm:$0xff]  ;;  %vm253_vm1 = vcmask 130048   ;;  %s440_s21 = sshll.u32 %s655_s12, 3 }
  0x28   : > { %435 = vmatpush.xpose.msk.msra.mxu0 %vm223_vm0, %v222_v0  ;;  %280 = vmatpush.msra.mxu1 %v222_v0  ;;  %v220_v2 = vld [vmem:[%s183_s7] sm:$0xff]  ;;  %s314_s18 = scalar_lea.hbm %s836_s2, %s440_s21  ;;  %s219_s20 = scalar_lea.vmem [#allocation7], %s432_s4 }
  0x29   : > { %s316_s26 = sshll.u32 %s219_s20, 4  ;;  %s318_s19 = sshll.u32 %s314_s18, 4  ;;  %s317_s26 = int_to_ptr.vmem [resolvable:$true] %s316_s26  ;;  %s319_s19 = int_to_ptr.hbm [resolvable:$true] %s318_s19 }
  0x2a   : > { %281 = vmatpush.msra.mxu1 %v221_v1  ;;  %s303_s12 = scalar_lea.sflag [#allocation4], %s774_s3  ;;  %s591_s27 = sshra.s32 %s319_s19, 4  ;;  %s592_s27 = int_to_ptr.hbm [resolvable:$true] %s591_s27 }
  0x2b   : > { %s593_s28 = scalar_lea.hbm %s592_s27, 8  ;;  %s597_s4 = scalar_lea.hbm %s836_s2, 16 }
  0x2c   : > { %436 = vmatpush.xpose.msk.msra.mxu0 %vm223_vm0, %v221_v1  ;;  %p594_p4 = scmp.ne.s32.totalorder %s592_s27, %s593_s28  ;;  %p598_p7 = scmp.lt.s32.totalorder %s592_s27, %s836_s2 }
  0x2d   : > { %p599_p8 = scmp.lt.s32.totalorder %s597_s4, %s593_s28 }
  0x2e   : > { %p595_p5 = pnand %p594_p4, %p733_p9 }
  0x2f   : > { %437 = vmatmul.msk.f32.vlgmr.msra.gmra.mxu0 %vm223_vm0, %v220_v2  ;;  %p600_p10 = por %p599_p8, %p598_p7 }
  0x30   : > { %p596_p6 = pneg %p595_p5 }
  0x32   : > { %p601_p13 = pnand %p600_p10, %p596_p6 }
  0xac   : > { %v250_v3 = vpop.f32.mrf.mxu0 }
  0xad   : > { %v254_v4 = vsel %vm253_vm1, %v250_v3, -inf }
  0xae   : > { %255 = vmax.xlane.f32.xlu0 %v254_v4 }
 0x121   : > { %v256_v5 = vpop.xlane.xlu0 %255 }
 0x122   : > { %v257_v6 = vsub.f32 %v250_v3, %v256_v5 }
 0x124   : > { %v258_v7 = vmul.f32 1.442695, %v257_v6 }
 0x126   : > { %513 = vpow2.f32 %v258_v7 }
 0x12c   : > { %v514_v8 = vpop.eup %513 }
 0x12d   : > { %438 = vmatmul.msk.f32.vlgmr.msra.gmra.mxu1 %vm253_vm1, %v514_v8  ;;  %v260_v9 = vsel %vm253_vm1, %v514_v8, 0.0 }
 0x12e   : > { %261 = vadd.xlane.f32.xlu0 %v260_v9 }
 0x1a1   : > { %v262_v10 = vpop.xlane.xlu0 %261 }
 0x1a2   : > { %515 = vrcp.f32 %v262_v10  ;;  %v297_v14 = vand.u32 2147483648, %v262_v10  ;;  %v295_v16 = vand.u32 2147483647, %v262_v10  ;;  %vm291_vm3 = vweird.f32 %v262_v10 }
 0x1a4   : > { %v298_v18 = vor.u32 1.1754944e-38, %v297_v14  ;;  %vm296_vm5 = vcmp.eq.f32.partialorder %v295_v16, 8.507059e+37 }
 0x1a8   : > { %v516_v11 = vpop.eup %515 }
 0x1a9   : > { %v287_v12 = vmul.f32 %v516_v11, %v262_v10  ;;  %vm292_vm2 = vweird.f32 %v516_v11 }
 0x1aa   : > { %vm293_vm4 = vmor %vm291_vm3, %vm292_vm2  ;;  %v283_v20 = vpop.f32.mrf.mxu1 }
 0x1ab   : > { %v288_v13 = vsub.f32 1.0, %v287_v12 }
 0x1ad   : > { %v289_v15 = vmul.f32 %v516_v11, %v288_v13 }
 0x1af   : > { %v290_v17 = vadd.f32 %v516_v11, %v289_v15 }
 0x1b1   : > { %v294_v19 = vsel %vm293_vm4, %v516_v11, %v290_v17 }
 0x1b2   : > { %v299_v21 = vsel %vm296_vm5, %v298_v18, %v294_v19 }
 0x1b3   : > { %v300_v22 = vmul.f32 %v299_v21, %v283_v20 }
 0x1b5   : > { %301 = vst.msk [vmem:[%s219_s20] sm:$0xff] %vm223_vm0, %v300_v22 }
 0x1b6   : > { %604 = shalt.err (!%p601_p13)
}
 0x1b7   : > { %448 = dma.vmem_to_hbm [thread:$0]  (%p733_p9), %s317_s26, 128, %s319_s19, %s303_s12  }
 0x1b8 PF: > { %s330_s3 = sand.u32 1, %s643_s9   ;;  %p458_p0 = pnand %p425_p12, %p740_p11 }
 0x1b9   : > { %s331_s25 = scalar_lea.sflag [#allocation4], %s330_s3 }
 0x1ba   : > { %p459_p1 = pneg %p458_p0 }
 0x1bc   : > { %638 = dma.done.wait (%p459_p1), %s331_s25, 128  }
 0x1bd   : > { %640 = vsyncadd (%p459_p1), %s331_s25, 4294967168  ;;  %s21_s14 = sadd.s32 1, %s663_s14   ;;  %s842_s9 = smov %s647_s10 }
 0x1be   : > { %p18_p2 = scmp.ge.s32.totalorder %s21_s14, 4   ;;  %s843_s10 = smov %s651_s11 }
 0x1bf   : > { %s844_s11 = smov %s738_s23  ;;  %s845_s12 = smov %s659_s13 }
 0x1c0   : > { %s846_s13 = smov %s848_s17  ;;  %20 = sbr.rel (!%p18_p2) target bundleno = 8 (0x8), region = 86 }
 0x1c5   :  { %337 = vsyncpa [#allocation3], 1 }
 0x1c6   :  { %339 = vsyncpa [#allocation3 + $0x1], 1 }
 0x1c7   :  { %340 = vsyncpa [#allocation6], 1 }
 0x1c8   :  { %342 = vsyncpa [#allocation6 + $0x1], 1 }
 0x1c9   :  { %343 = vsyncpa [#allocation4], 1 }
 0x1ca   :  { %345 = vsyncpa [#allocation4 + $0x1], 1 }

</bundles_post_ra>
